<compile_context>
chip_gen: v7x
topology: tpu7x:2x2x1
jax: 0.10.0
libtpu: 0.0.40
codegen_flags: <defaults>
</compile_context>

<pallas_src>
import functools

import jax
import jax.numpy as jnp
from jax.experimental import pallas as pl
from jax.experimental.pallas import tpu as pltpu

_LANE = 128


def _round_up(v, m):
    return ((v + m - 1) // m) * m


def _mlp_kernel(x_ref, w1_ref, b1_ref, w2_ref, b2_ref, o_ref):
    """Fused forward of one node tile: relu(x @ W1 + b1) @ W2 + b2.

    x arrives in f32 (no wrapper pad/cast); it is cast to bf16 here so both
    matmuls run as bf16 MXU ops with f32 accumulation.  Bias adds and ReLU
    stay in f32; the store is bf16 (lane-dense padded output slab).
    """
    x = x_ref[...].astype(jnp.bfloat16)
    h = jnp.dot(x, w1_ref[...], preferred_element_type=jnp.float32)
    h = jnp.maximum(h + b1_ref[...], 0.0)                      # f32 bias + ReLU
    y = jnp.dot(h.astype(jnp.bfloat16), w2_ref[...],
                preferred_element_type=jnp.float32)
    o_ref[...] = (y + b2_ref[...]).astype(o_ref.dtype)         # bf16 store


@functools.partial(jax.jit, static_argnames=("out_dim", "tile_n"))
def inner_model_forward(x, w1p, b1p, w2p, b2p, *, out_dim, tile_n=512):
    """N-tiled Pallas forward.

    x:   [N, IN]      f32, unpadded (IN is the full last dim -> legal block).
    w1p: [IN, HID_P]  bf16, hidden dim zero-padded to a multiple of 128.
    b1p: [1,  HID_P]  f32.
    w2p: [HID_P, OUT_P] bf16, both dims padded (zero rows/cols are inert).
    b2p: [1,  OUT_P]  f32.
    Returns [N, out_dim] f32 (matches the PyTorch module's dtype).
    """
    n, in_dim = x.shape
    hid_p = w1p.shape[1]
    out_p = w2p.shape[1]

    # Keep >= 2 grid steps when there is enough work so the "parallel" node
    # axis actually shards across both TensorCores on v7x; min tile 128 rows.
    half = _round_up(max(1, -(-n // 2)), _LANE)
    tile = max(_LANE, min(tile_n, half))
    grid = (pl.cdiv(n, tile),)

    cost = pl.CostEstimate(
        flops=2 * grid[0] * tile * (in_dim * hid_p + hid_p * out_p),
        transcendentals=0,
        bytes_accessed=(x.size * x.dtype.itemsize
                        + w1p.size * 2 + w2p.size * 2
                        + b1p.size * 4 + b2p.size * 4
                        + n * out_p * 2),
    )

    # Rough per-call VMEM footprint: double-buffered x/out tiles, resident
    # weights/biases, f32 hidden intermediate.  Only raise the scoped limit
    # when a large tile_n actually needs it (respects v5e's 16 MiB default).
    vmem_est = (2 * tile * in_dim * x.dtype.itemsize
                + 2 * tile * out_p * 2
                + w1p.size * 2 + w2p.size * 2
                + (b1p.size + b2p.size) * 4
                + tile * hid_p * 4)
    vmem_limit = None
    if vmem_est > 12 * 1024 * 1024:
        vmem_limit = min(int(2 * vmem_est), 56 * 1024 * 1024)

    yp = pl.pallas_call(
        _mlp_kernel,
        out_shape=jax.ShapeDtypeStruct((n, out_p), jnp.bfloat16),
        grid=grid,
        in_specs=[
            # x: streamed over node tiles (auto double-buffered).
            pl.BlockSpec((tile, in_dim), lambda i: (i, 0)),
            # Weights / biases: constant index_map -> loaded once, VMEM-resident.
            pl.BlockSpec((in_dim, hid_p), lambda i: (0, 0)),
            pl.BlockSpec((1, hid_p), lambda i: (0, 0)),
            pl.BlockSpec((hid_p, out_p), lambda i: (0, 0)),
            pl.BlockSpec((1, out_p), lambda i: (0, 0)),
        ],
        out_specs=pl.BlockSpec((tile, out_p), lambda i: (i, 0)),
        compiler_params=pltpu.CompilerParams(
            dimension_semantics=("parallel",),   # node axis -> 2-TC sharding on v7x
            vmem_limit_bytes=vmem_limit,
        ),
        cost_estimate=cost,
    )(x, w1p, b1p, w2p, b2p)

    # Drop padded output lanes; return f32 like the original module (cheap,
    # fused with the custom call under jit).
    return yp[:, :out_dim].astype(jnp.float32)


class InnerModel:
    """Synthetic inner model (2-layer MLP) whose forward runs in Pallas."""

    def __init__(self, key, in_dim, hid_dim, out_dim):
        k1, k2, k3, k4 = jax.random.split(key, 4)
        # Deterministic Kaiming-like init (no checkpoint loading).
        self.w1 = jax.random.normal(k1, (in_dim, hid_dim), jnp.float32) * (2.0 / in_dim) ** 0.5
        self.b1 = jax.random.normal(k2, (1, hid_dim), jnp.float32) * 0.01
        self.w2 = jax.random.normal(k3, (hid_dim, out_dim), jnp.float32) * (2.0 / hid_dim) ** 0.5
        self.b2 = jax.random.normal(k4, (1, out_dim), jnp.float32) * 0.01
        self.out_dim = out_dim

        # One-time padded / bf16 kernel operands (hoisted out of the forward path).
        hid_p = _round_up(hid_dim, _LANE)
        out_p = _round_up(out_dim, _LANE)
        self._w1p = jnp.zeros((in_dim, hid_p), jnp.bfloat16).at[:, :hid_dim].set(
            self.w1.astype(jnp.bfloat16))
        self._b1p = jnp.zeros((1, hid_p), jnp.float32).at[:, :hid_dim].set(self.b1)
        self._w2p = jnp.zeros((hid_p, out_p), jnp.bfloat16).at[:hid_dim, :out_dim].set(
            self.w2.astype(jnp.bfloat16))
        self._b2p = jnp.zeros((1, out_p), jnp.float32).at[:, :out_dim].set(self.b2)

    def parameters(self):
        return [self.w1, self.b1, self.w2, self.b2]

    def __call__(self, x):
        return inner_model_forward(x, self._w1p, self._b1p, self._w2p, self._b2p,
                                   out_dim=self.out_dim)


class EditableModel:
    """JAX port of EditableModel: forward is a pure pass-through to `model`."""

    def __init__(self, model, config=None, model_constructor=None):
        self.model = model
        self.config = config
        self.model_constructor = model_constructor

    def forward(self, *inputs, **kwargs):
        return self.model(*inputs, **kwargs)

    __call__ = forward

    def outer_parameters(self):
        # In JAX all arrays are "trainable"; mirrors the requires_grad filter.
        return list(self.model.parameters())


if __name__ == "__main__":
    # Small node-feature shapes; N is deliberately not a tile multiple to
    # exercise the uneven-grid path (cdiv grid, masked edge tile).
    N, IN, HID, OUT = 300, 32, 64, 16

    key = jax.random.PRNGKey(0)
    k_model, k_x = jax.random.split(key)

    inner = InnerModel(k_model, IN, HID, OUT)
    editable = EditableModel(
        inner,
        config={"synthetic": True},
        model_constructor=lambda: InnerModel(k_model, IN, HID, OUT),
    )

    x = jax.random.normal(k_x, (N, IN), jnp.float32)

    out = jax.block_until_ready(editable(x))
    assert out.shape == (N, OUT)

    # Reference with the SAME quantization the kernel uses (bf16 MXU operands,
    # f32 accumulation, bf16 store): tight tolerance (1 bf16 ulp slack for
    # accumulation-order / rounding-boundary differences).
    xb = x.astype(jnp.bfloat16)
    h = jnp.dot(xb, inner.w1.astype(jnp.bfloat16), preferred_element_type=jnp.float32)
    h = jnp.maximum(h + inner.b1, 0.0)
    y = jnp.dot(h.astype(jnp.bfloat16), inner.w2.astype(jnp.bfloat16),
                preferred_element_type=jnp.float32)
    ref_q = (y + inner.b2).astype(jnp.bfloat16).astype(jnp.float32)
    assert jnp.allclose(out, ref_q, atol=1e-2, rtol=1e-2), (
        float(jnp.max(jnp.abs(out - ref_q))))

    # Loose sanity check against the pure-f32 reference (bf16 rounding budget).
    ref = jnp.maximum(x @ inner.w1 + inner.b1, 0.0) @ inner.w2 + inner.b2
    assert jnp.allclose(out, ref, atol=1e-1, rtol=1e-1), (
        float(jnp.max(jnp.abs(out - ref))))

    print("KERNEL_OK")
</pallas_src>

<mosaic_0001>
module attributes {stable_mosaic.version = 11 : i64} {
  func.func @_mlp_kernel(%arg0: i32, %arg1: memref<256x32xf32, #tpu.memory_space<vmem>>, %arg2: memref<32x128xbf16, #tpu.memory_space<vmem>>, %arg3: memref<1x128xf32, #tpu.memory_space<vmem>>, %arg4: memref<128x128xbf16, #tpu.memory_space<vmem>>, %arg5: memref<1x128xf32, #tpu.memory_space<vmem>>, %arg6: memref<256x128xbf16, #tpu.memory_space<vmem>>) attributes {dimension_semantics = [#tpu.dimension_semantics<parallel>], iteration_bounds = array<i64: 2>, scalar_prefetch = 0 : i64, scratch_operands = 0 : i64, tpu.core_type = #tpu.core_type<tc>, window_params = [{transform_indices = @transform_0, window_bounds = array<i64: 256, 32>}, {pipeline_mode = #tpu.pipeline_mode<synchronous>, transform_indices = @transform_1, window_bounds = array<i64: 32, 128>}, {pipeline_mode = #tpu.pipeline_mode<synchronous>, transform_indices = @transform_2, window_bounds = array<i64: 1, 128>}, {pipeline_mode = #tpu.pipeline_mode<synchronous>, transform_indices = @transform_3, window_bounds = array<i64: 128, 128>}, {pipeline_mode = #tpu.pipeline_mode<synchronous>, transform_indices = @transform_4, window_bounds = array<i64: 1, 128>}, {transform_indices = @transform_5, window_bounds = array<i64: 256, 128>}]} {
    %c0 = arith.constant 0 : index
    %c0_0 = arith.constant 0 : index
    %0 = vector.load %arg1[%c0, %c0_0] : memref<256x32xf32, #tpu.memory_space<vmem>>, vector<256x32xf32>
    %1 = arith.truncf %0 : vector<256x32xf32> to vector<256x32xbf16>
    %c0_1 = arith.constant 0 : index
    %c0_2 = arith.constant 0 : index
    %2 = vector.load %arg2[%c0_1, %c0_2] : memref<32x128xbf16, #tpu.memory_space<vmem>>, vector<32x128xbf16>
    %cst = arith.constant dense<0.000000e+00> : vector<256x128xf32>
    %3 = tpu.matmul %1, %2, %cst {dimension_numbers = #tpu.dot_dimension_numbers<[1], [0], [0], [1], [0, 0, 1, 1], [], []>} : vector<256x32xbf16>, vector<32x128xbf16>, vector<256x128xf32> -> vector<256x128xf32>
    %c0_3 = arith.constant 0 : index
    %c0_4 = arith.constant 0 : index
    %4 = vector.load %arg3[%c0_3, %c0_4] : memref<1x128xf32, #tpu.memory_space<vmem>>, vector<1x128xf32>
    %5 = vector.broadcast %4 : vector<1x128xf32> to vector<256x128xf32>
    %6 = arith.addf %3, %5 : vector<256x128xf32>
    %cst_5 = arith.constant 0.000000e+00 : f32
    %7 = vector.broadcast %cst_5 : f32 to vector<256x128xf32>
    %8 = arith.maximumf %6, %7 : vector<256x128xf32>
    %9 = arith.truncf %8 : vector<256x128xf32> to vector<256x128xbf16>
    %c0_6 = arith.constant 0 : index
    %c0_7 = arith.constant 0 : index
    %10 = vector.load %arg4[%c0_6, %c0_7] : memref<128x128xbf16, #tpu.memory_space<vmem>>, vector<128x128xbf16>
    %cst_8 = arith.constant dense<0.000000e+00> : vector<256x128xf32>
    %11 = tpu.matmul %9, %10, %cst_8 {dimension_numbers = #tpu.dot_dimension_numbers<[1], [0], [0], [1], [0, 0, 1, 1], [], []>} : vector<256x128xbf16>, vector<128x128xbf16>, vector<256x128xf32> -> vector<256x128xf32>
    %c0_9 = arith.constant 0 : index
    %c0_10 = arith.constant 0 : index
    %12 = vector.load %arg5[%c0_9, %c0_10] : memref<1x128xf32, #tpu.memory_space<vmem>>, vector<1x128xf32>
    %13 = vector.broadcast %12 : vector<1x128xf32> to vector<256x128xf32>
    %14 = arith.addf %11, %13 : vector<256x128xf32>
    %15 = arith.truncf %14 : vector<256x128xf32> to vector<256x128xbf16>
    %c0_11 = arith.constant 0 : index
    %c0_12 = arith.constant 0 : index
    %16 = vector.load %arg6[%c0_11, %c0_12] : memref<256x128xbf16, #tpu.memory_space<vmem>>, vector<256x128xbf16>
    tpu.vector_store %arg6[%c0_11, %c0_12], %15 {strides = array<i32>} : memref<256x128xbf16, #tpu.memory_space<vmem>>, vector<256x128xbf16>,
    return
  }
  func.func @transform_0(%arg0: i32) -> (i32, i32) {
    %c0_i32 = arith.constant 0 : i32
    %c0_i32_0 = arith.constant 0 : i32
    return %arg0, %c0_i32 : i32, i32
  }
  func.func @transform_1(%arg0: i32) -> (i32, i32) {
    %c0_i32 = arith.constant 0 : i32
    %c0_i32_0 = arith.constant 0 : i32
    %c0_i32_1 = arith.constant 0 : i32
    return %c0_i32, %c0_i32_0 : i32, i32
  }
  func.func @transform_2(%arg0: i32) -> (i32, i32) {
    %c0_i32 = arith.constant 0 : i32
    %c0_i32_0 = arith.constant 0 : i32
    %c0_i32_1 = arith.constant 0 : i32
    return %c0_i32, %c0_i32_0 : i32, i32
  }
  func.func @transform_3(%arg0: i32) -> (i32, i32) {
    %c0_i32 = arith.constant 0 : i32
    %c0_i32_0 = arith.constant 0 : i32
    %c0_i32_1 = arith.constant 0 : i32
    return %c0_i32, %c0_i32_0 : i32, i32
  }
  func.func @transform_4(%arg0: i32) -> (i32, i32) {
    %c0_i32 = arith.constant 0 : i32
    %c0_i32_0 = arith.constant 0 : i32
    %c0_i32_1 = arith.constant 0 : i32
    return %c0_i32, %c0_i32_0 : i32, i32
  }
  func.func @transform_5(%arg0: i32) -> (i32, i32) {
    %c0_i32 = arith.constant 0 : i32
    %c0_i32_0 = arith.constant 0 : i32
    return %arg0, %c0_i32 : i32, i32
  }
}

</mosaic_0001>

<bundles_post_ra>
// kernel: inner_model_forward.1
= control target key start
LH: loop header
LB: loop body
LE: loop exit
PB: predicated region body
PF: predicated region fallthrough
CT: control target
= control target key end

     0   :  { %s1878_s18 = smov 0   ;;  %s1880_s19 = smov 0   ;;  %s2223_s0 = inlined_call_operand.vmem [shape: f32[300,32], index: 0, kind: input, shape index: {}]   ;;  %s2224_s1 = inlined_call_operand.vmem [shape: bf16[32,128], index: 1, kind: input, shape index: {}]   ;;  %s2225_s2 = inlined_call_operand.vmem [shape: f32[1,128], index: 2, kind: input, shape index: {}]   ;;  %s2226_s3 = inlined_call_operand.vmem [shape: bf16[128,128], index: 3, kind: input, shape index: {}]   ;;  %s2227_s4 = inlined_call_operand.vmem [shape: f32[1,128], index: 4, kind: input, shape index: {}]   ;;  %s2228_s5 = inlined_call_operand.vmem [shape: bf16[300,128], index: 5, kind: output, shape index: {}]  }
   0x1   :  { %s1882_s20 = smov 0  }
   0x2 LB: > { %s1891_s21 = sadd.s32 4294967295, %s1814_s20   ;;  %s1893_s22 = sadd.s32 1, %s1814_s20   ;;  %s1814_s20 = sphi %s1882_s20, %s2235_s20   ;;  %s1810_s19 = sphi %s1880_s19, %s2234_s19   ;;  %s1806_s18 = sphi %s1878_s18, %s2233_s18  }
   0x3   : > { %s129_s23 = ssub.s32 %s1814_s20, %s1893_s22  ;;  %s132_s24 = sadd.s32 1, %s1810_s19 }
   0x4   : > { %p130_p0 = scmp.eq.s32.totalorder %s129_s23, 0  ;;  %p142_p1 = scmp.ne.s32.totalorder %s1810_s19, %s1806_s18 }
   0x5   : > { %p143_p2 = scmp.eq.s32.totalorder %s1891_s21, 1  ;;  %p1309_p3 = scmp.ge.s32.totalorder %s1814_s20, 1 }
   0x6   : > { %s1901_s25 = scalar_select %p130_p0, %s1810_s19, %s132_s24  }
   0x7   : > { %p1903_p4 = por %p143_p2, %p142_p1  ;;  %p196_p5 = scmp.lt.s32.totalorder %s1814_s20, 3 }
   0x9   : > { %p197_p6 = pnand %p1309_p3, %p196_p5 }
   0xa   : > { %v1750_v0 = vld [vmem:[%s2224_s1] sm:$0xff] (!%p197_p6)   ;;  %s1911_s29 = sshll.u32 (!%p197_p6), %s1891_s21, 5  ;;  %v1751_v1 = vld [vmem:[%s2224_s1 + $0x8] sm:$0xff] (!%p197_p6)   ;;  %v1754_v4 = vld [vmem:[%s2226_s3 + $0x10] sm:$0xff] (!%p197_p6)   ;;  %vm318_vm0 = vcmask (!%p197_p6), 261120  }
   0xb   : > { %200 = sbr.rel (%p197_p6) target bundleno = 594 (0x252), region = 40  ;;  %p232_p7 = scmp.lt.s32.totalorder (!%p197_p6), %s1911_s29, 37  ;;  %1562 = vmatprep.subr.bf16.mxu0 (!%p197_p6), %v1750_v0  ;;  %v1752_v2 = vld [vmem:[%s2226_s3] sm:$0xff] (!%p197_p6)   ;;  %v1753_v3 = vld [vmem:[%s2226_s3 + $0x8] sm:$0xff] (!%p197_p6)   ;;  %v1755_v16 = vld [vmem:[%s2226_s3 + $0x18] sm:$0xff] (!%p197_p6)  }
   0xc   : > { %1563 = vmatpush3.bf16.msra.mxu0 (!%p197_p6), %v1750_v0  ;;  %1646 = vmatprep.subr.bf16.mxu1 (!%p197_p6), %v1752_v2  ;;  %v1756_v21 = vld [vmem:[%s2226_s3 + $0x20] sm:$0xff] (!%p197_p6)   ;;  %v1757_v24 = vld [vmem:[%s2226_s3 + $0x28] sm:$0xff] (!%p197_p6)   ;;  %v1758_v56 = vld [vmem:[%s2226_s3 + $0x30] sm:$0xff] (!%p197_p6)  }
   0xd   : > { %1564 = vmatprep.subr.bf16.mxu0 (!%p197_p6), %v1751_v1  ;;  %1654 = vmatpush3.bf16.msra.mxu1 (!%p197_p6), %v1752_v2  ;;  %v1759_v57 = vld [vmem:[%s2226_s3 + $0x38] sm:$0xff] (!%p197_p6)   ;;  %v1998_v58 = vld [vmem:[%s2225_s2] ss:$0 sm:$0xff] (!%p197_p6) }
   0xe   : > { %1647 = vmatprep.subr.bf16.mxu1 (!%p197_p6), %v1753_v3 }
  0x10   : > { %1565 = vmatpush3.bf16.msra.mxu0 (!%p197_p6), %v1751_v1 }
  0x11   : > { %1598 = vmatprep.subr.bf16.mxu0 (!%p197_p6), %v1752_v2  ;;  %1655 = vmatpush3.bf16.msra.mxu1 (!%p197_p6), %v1753_v3 }
  0x12   : > { %s233_s9 = scalar_select %p232_p7, %s1911_s29, 37  ;;  %1648 = vmatprep.subr.bf16.mxu1 %v1754_v4 }
  0x13   : > { %s976_s16 = ssub.s32 (%p1903_p4), 38, %s1911_s29  ;;  %s1422_s17 = sshll.u32 (%p1903_p4), %s1891_s21, 7 }
  0x14   : > { %s1312_s12 = sshll.u32 %s233_s9, 3  ;;  %p977_p8 = scmp.lt.s32.totalorder (%p1903_p4), %s976_s16, 32 }
  0x15   : > { %s1927_s15 = scalar_lea.vmem %s2223_s0, %s1312_s12  ;;  %1656 = vmatpush3.bf16.msra.mxu1 %v1754_v4  ;;  %s224_s12 = sand.u32 1, %s1806_s18  }
  0x16   : > { %v247_v5 = vld [vmem:[%s1927_s15] sm:$0xff]  ;;  %v248_v6 = vld [vmem:[%s1927_s15 + $0x8] sm:$0xff]  ;;  %v249_v7 = vld [vmem:[%s1927_s15 + $0x10] sm:$0xff]  ;;  %1649 = vmatprep.subr.bf16.mxu1 %v1755_v16  ;;  %s2095_s24 = scalar_lea.vmem (%p1903_p4), %s2228_s5, %s1422_s17  }
  0x17   : > { %v279_v8 = vpack.c.bf16 %v248_v6, %v247_v5  ;;  %v250_v9 = vld [vmem:[%s1927_s15 + $0x18] sm:$0xff]  ;;  %v251_v10 = vld [vmem:[%s1927_s15 + $0x20] sm:$0xff]  ;;  %v252_v11 = vld [vmem:[%s1927_s15 + $0x28] sm:$0xff] }
  0x18   : > { %v280_v12 = vpack.c.bf16 %v250_v9, %v249_v7  ;;  %v281_v13 = vpack.c.bf16 %v252_v11, %v251_v10  ;;  %v253_v14 = vld [vmem:[%s1927_s15 + $0x30] sm:$0xff]  ;;  %v254_v15 = vld [vmem:[%s1927_s15 + $0x38] sm:$0xff]  ;;  %v255_v17 = vld [vmem:[%s1927_s15 + $0x40] sm:$0xff] }
  0x19   : > { %1566 = vmatprep.mubr.msk.bf16.mxu0 %vm318_vm0, %v279_v8  ;;  %v256_v18 = vld [vmem:[%s1927_s15 + $0x48] sm:$0xff]  ;;  %v282_v19 = vpack.c.bf16 %v254_v15, %v253_v14  ;;  %1657 = vmatpush3.bf16.msra.mxu1 %v1755_v16  ;;  %v257_v22 = vld [vmem:[%s1927_s15 + $0x50] sm:$0xff]  ;;  %v258_v23 = vld [vmem:[%s1927_s15 + $0x58] sm:$0xff] }
  0x1a   : > { %1567 = vmatmul.mubr.msk.bf16.vlgmr.msra.gmra.mrb[0].mxu0 %vm318_vm0, %v280_v12  ;;  %v283_v20 = vpack.c.bf16 %v256_v18, %v255_v17  ;;  %1650 = vmatprep.subr.bf16.mxu1 %v1756_v21  ;;  %v259_v25 = vld [vmem:[%s1927_s15 + $0x60] sm:$0xff]  ;;  %v260_v26 = vld [vmem:[%s1927_s15 + $0x68] sm:$0xff]  ;;  %v284_v27 = vpack.c.bf16 %v258_v23, %v257_v22  ;;  %v261_v29 = vld [vmem:[%s1927_s15 + $0x70] sm:$0xff] }
  0x1b   : > { %1570 = vmatprep.mubr.msk.bf16.mxu0 %vm318_vm0, %v281_v13  ;;  %1599 = vmatpush3.bf16.msra.mxu0 %v1752_v2  ;;  %v285_v28 = vpack.c.bf16 %v260_v26, %v259_v25  ;;  %v262_v30 = vld [vmem:[%s1927_s15 + $0x78] sm:$0xff]  ;;  %v263_v31 = vld [vmem:[%s1927_s15 + $0x80] sm:$0xff]  ;;  %v264_v32 = vld [vmem:[%s1927_s15 + $0x88] sm:$0xff] }
  0x1c   : > { %1600 = vmatprep.subr.bf16.mxu0 %v1753_v3  ;;  %v286_v33 = vpack.c.bf16 %v262_v30, %v261_v29  ;;  %v287_v34 = vpack.c.bf16 %v264_v32, %v263_v31  ;;  %v265_v35 = vld [vmem:[%s1927_s15 + $0x90] sm:$0xff]  ;;  %v266_v36 = vld [vmem:[%s1927_s15 + $0x98] sm:$0xff]  ;;  %v267_v37 = vld [vmem:[%s1927_s15 + $0xa0] sm:$0xff] }
  0x1d   : > { %1658 = vmatpush3.bf16.msra.mxu1 %v1756_v21  ;;  %v268_v38 = vld [vmem:[%s1927_s15 + $0xa8] sm:$0xff]  ;;  %v288_v39 = vpack.c.bf16 %v266_v36, %v265_v35  ;;  %v269_v41 = vld [vmem:[%s1927_s15 + $0xb0] sm:$0xff]  ;;  %v270_v42 = vld [vmem:[%s1927_s15 + $0xb8] sm:$0xff] }
  0x1e   : > { %1651 = vmatprep.subr.bf16.mxu1 %v1757_v24  ;;  %v289_v40 = vpack.c.bf16 %v268_v38, %v267_v37  ;;  %v271_v43 = vld [vmem:[%s1927_s15 + $0xc0] sm:$0xff]  ;;  %v272_v44 = vld [vmem:[%s1927_s15 + $0xc8] sm:$0xff]  ;;  %v290_v45 = vpack.c.bf16 %v270_v42, %v269_v41  ;;  %v273_v47 = vld [vmem:[%s1927_s15 + $0xd0] sm:$0xff] }
  0x1f   : > { %1601 = vmatpush3.bf16.msra.mxu0 %v1753_v3  ;;  %v291_v46 = vpack.c.bf16 %v272_v44, %v271_v43  ;;  %v274_v48 = vld [vmem:[%s1927_s15 + $0xd8] sm:$0xff]  ;;  %v275_v49 = vld [vmem:[%s1927_s15 + $0xe0] sm:$0xff]  ;;  %v276_v50 = vld [vmem:[%s1927_s15 + $0xe8] sm:$0xff] }
  0x20   : > { %1602 = vmatprep.subr.bf16.mxu0 %v1754_v4  ;;  %v292_v51 = vpack.c.bf16 %v274_v48, %v273_v47  ;;  %v293_v52 = vpack.c.bf16 %v276_v50, %v275_v49  ;;  %v277_v53 = vld [vmem:[%s1927_s15 + $0xf0] sm:$0xff]  ;;  %v278_v54 = vld [vmem:[%s1927_s15 + $0xf8] sm:$0xff]  ;;  %s1310_s15 = sshll.u32 %s224_s12, 7 }
  0x21   : > { %1659 = vmatpush3.bf16.msra.mxu1 %v1757_v24  ;;  %v294_v55 = vpack.c.bf16 %v278_v54, %v277_v53  ;;  %s2042_s18 = scalar_lea.vmem [#allocation2], %s1310_s15  }
  0x22   : > { %1571 = vmatmul.mubr.msk.bf16.gmra.mrb[4].mxu0 %vm318_vm0, %v282_v19  ;;  %1652 = vmatprep.subr.bf16.mxu1 %v1758_v56 }
  0x23   : > { %1574 = vmatprep.mubr.msk.bf16.mxu0 %vm318_vm0, %v283_v20  ;;  %1603 = vmatpush3.bf16.msra.mxu0 %v1754_v4 }
  0x24   : > { %1604 = vmatprep.subr.bf16.mxu0 %v1755_v16 }
  0x25   : > { %1660 = vmatpush3.bf16.msra.mxu1 %v1758_v56 }
  0x26   : > { %1653 = vmatprep.subr.bf16.mxu1 %v1759_v57 }
  0x27   : > { %1605 = vmatpush3.bf16.msra.mxu0 %v1755_v16 }
  0x28   : > { %1606 = vmatprep.subr.bf16.mxu0 %v1756_v21 }
  0x29   : > { %1661 = vmatpush3.bf16.msra.mxu1 %v1759_v57 }
  0x2a   : > { %1575 = vmatmul.mubr.msk.bf16.gmra.mrb[8].mxu0 %vm318_vm0, %v284_v27 }
  0x2b   : > { %1578 = vmatprep.mubr.msk.bf16.mxu0 %vm318_vm0, %v285_v28  ;;  %1607 = vmatpush3.bf16.msra.mxu0 %v1756_v21 }
  0x2c   : > { %1608 = vmatprep.subr.bf16.mxu0 %v1757_v24 }
  0x2f   : > { %1609 = vmatpush3.bf16.msra.mxu0 %v1757_v24 }
  0x30   : > { %1610 = vmatprep.subr.bf16.mxu0 %v1758_v56 }
  0x32   : > { %1579 = vmatmul.mubr.msk.bf16.gmra.mrb[12].mxu0 %vm318_vm0, %v286_v33 }
  0x33   : > { %1582 = vmatprep.mubr.msk.bf16.mxu0 %vm318_vm0, %v287_v34  ;;  %1611 = vmatpush3.bf16.msra.mxu0 %v1758_v56 }
  0x34   : > { %1612 = vmatprep.subr.bf16.mxu0 %v1759_v57 }
  0x37   : > { %1613 = vmatpush3.bf16.msra.mxu0 %v1759_v57 }
  0x3a   : > { %1583 = vmatmul.mubr.msk.bf16.gmra.mrb[16].mxu0 %vm318_vm0, %v288_v39 }
  0x3b   : > { %1586 = vmatprep.mubr.msk.bf16.mxu0 %vm318_vm0, %v289_v40 }
  0x42   : > { %1587 = vmatmul.mubr.msk.bf16.gmra.mrb[20].mxu0 %vm318_vm0, %v290_v45 }
  0x43   : > { %1590 = vmatprep.mubr.msk.bf16.mxu0 %vm318_vm0, %v291_v46 }
  0x4a   : > { %1591 = vmatmul.mubr.msk.bf16.gmra.mrb[24].mxu0 %vm318_vm0, %v292_v51 }
  0x4b   : > { %1594 = vmatprep.mubr.msk.bf16.mxu0 %vm318_vm0, %v293_v52 }
  0x52   : > { %1595 = vmatmul.mubr.msk.bf16.gmra.mrb[28].mxu0 %vm318_vm0, %v294_v55 }
  0xed   : > { %v1568_v59 = vpop.f32.mrb[0].mxu0 }
  0xee   : > { %v410_v60 = vadd.f32 %v1568_v59, %v1998_v58  ;;  %v401_v61 = vpop.f32.mrb[1].mxu0 }
  0xef   : > { %v402_v62 = vadd.f32 %v1998_v58, %v401_v61  ;;  %v1569_v63 = vpop.f32.mrb[2].mxu0 }
  0xf0   : > { %v413_v0 = vadd.f32 %v1569_v63, %v1998_v58  ;;  %v404_v1 = vpop.f32.mrb[3].mxu0  ;;  %v530_v3 = vmax.f32 %v410_v60, 0.0 }
  0xf1   : > { %v405_v2 = vadd.f32 %v1998_v58, %v404_v1  ;;  %v528_v5 = vmax.f32 %v402_v62, 0.0 }
  0xf2   : > { %v531_v4 = vmax.f32 %v413_v0, 0.0 }
  0xf3   : > { %v529_v6 = vmax.f32 %v405_v2, 0.0 }
  0xf4   : > { %v561_v7 = vpack.c.bf16 %v531_v4, %v530_v3 }
  0xf5   : > { %v560_v8 = vpack.c.bf16 %v529_v6, %v528_v5  ;;  %v1572_v9 = vpop.f32.mrb[4].mxu0 }
  0xf6   : > { %v426_v10 = vadd.f32 %v1572_v9, %v1998_v58  ;;  %v417_v11 = vpop.f32.mrb[5].mxu0 }
  0xf7   : > { %v418_v12 = vadd.f32 %v1998_v58, %v417_v11  ;;  %v1573_v13 = vpop.f32.mrb[6].mxu0  ;;  %1614 = vmatprep.mubr.bf16.mxu0 %v560_v8 }
  0xf8   : > { %v429_v14 = vadd.f32 %v1573_v13, %v1998_v58  ;;  %v420_v15 = vpop.f32.mrb[7].mxu0  ;;  %1615 = vmatmul.mubr.bf16.vlgmr.msra.gmra.mrb[32].mxu0 %v561_v7  ;;  %v534_v17 = vmax.f32 %v426_v10, 0.0 }
  0xf9   : > { %v421_v16 = vadd.f32 %v1998_v58, %v420_v15  ;;  %v532_v19 = vmax.f32 %v418_v12, 0.0 }
  0xfa   : > { %v535_v18 = vmax.f32 %v429_v14, 0.0 }
  0xfb   : > { %v533_v20 = vmax.f32 %v421_v16, 0.0 }
  0xfc   : > { %v563_v21 = vpack.c.bf16 %v535_v18, %v534_v17 }
  0xfd   : > { %v1576_v22 = vpop.f32.mrb[8].mxu0  ;;  %v562_v23 = vpack.c.bf16 %v533_v20, %v532_v19 }
  0xfe   : > { %v442_v24 = vadd.f32 %v1576_v22, %v1998_v58  ;;  %v433_v25 = vpop.f32.mrb[9].mxu0 }
  0xff   : > { %v434_v26 = vadd.f32 %v1998_v58, %v433_v25  ;;  %v1577_v27 = vpop.f32.mrb[10].mxu0  ;;  %1618 = vmatprep.mubr.bf16.mxu1 %v562_v23 }
 0x100   : > { %v445_v28 = vadd.f32 %v1577_v27, %v1998_v58  ;;  %v436_v29 = vpop.f32.mrb[11].mxu0  ;;  %1619 = vmatmul.mubr.bf16.vlgmr.msra.gmra.mrb[0].mxu1 %v563_v21  ;;  %v538_v31 = vmax.f32 %v442_v24, 0.0 }
 0x101   : > { %v437_v30 = vadd.f32 %v1998_v58, %v436_v29  ;;  %v536_v33 = vmax.f32 %v434_v26, 0.0 }
 0x102   : > { %v539_v32 = vmax.f32 %v445_v28, 0.0 }
 0x103   : > { %v537_v34 = vmax.f32 %v437_v30, 0.0 }
 0x104   : > { %v565_v35 = vpack.c.bf16 %v539_v32, %v538_v31 }
 0x105   : > { %v564_v36 = vpack.c.bf16 %v537_v34, %v536_v33  ;;  %v1580_v37 = vpop.f32.mrb[12].mxu0 }
 0x106   : > { %v458_v38 = vadd.f32 %v1580_v37, %v1998_v58  ;;  %v449_v39 = vpop.f32.mrb[13].mxu0 }
 0x107   : > { %v450_v40 = vadd.f32 %v1998_v58, %v449_v39  ;;  %v1581_v41 = vpop.f32.mrb[14].mxu0  ;;  %1622 = vmatprep.mubr.bf16.mxu1 %v564_v36 }
 0x108   : > { %v461_v42 = vadd.f32 %v1581_v41, %v1998_v58  ;;  %v452_v43 = vpop.f32.mrb[15].mxu0  ;;  %1623 = vmatmul.mubr.bf16.gmra.mrb[4].mxu1 %v565_v35  ;;  %v542_v45 = vmax.f32 %v458_v38, 0.0 }
 0x109   : > { %v453_v44 = vadd.f32 %v1998_v58, %v452_v43  ;;  %v540_v47 = vmax.f32 %v450_v40, 0.0 }
 0x10a   : > { %v543_v46 = vmax.f32 %v461_v42, 0.0 }
 0x10b   : > { %v541_v48 = vmax.f32 %v453_v44, 0.0 }
 0x10c   : > { %v567_v49 = vpack.c.bf16 %v543_v46, %v542_v45  ;;  %v2036_v45 = vld [vmem:[%s2227_s4] ss:$0 sm:$0xff] }
 0x10d   : > { %v566_v50 = vpack.c.bf16 %v541_v48, %v540_v47  ;;  %v1584_v51 = vpop.f32.mrb[16].mxu0 }
 0x10e   : > { %v474_v52 = vadd.f32 %v1584_v51, %v1998_v58  ;;  %v465_v53 = vpop.f32.mrb[17].mxu0 }
 0x10f   : > { %v466_v54 = vadd.f32 %v1998_v58, %v465_v53  ;;  %v1585_v55 = vpop.f32.mrb[18].mxu0  ;;  %1626 = vmatprep.mubr.bf16.mxu1 %v566_v50 }
 0x110   : > { %v477_v56 = vadd.f32 %v1585_v55, %v1998_v58  ;;  %v468_v57 = vpop.f32.mrb[19].mxu0  ;;  %1627 = vmatmul.mubr.bf16.gmra.mrb[8].mxu1 %v567_v49  ;;  %v546_v60 = vmax.f32 %v474_v52, 0.0 }
 0x111   : > { %v469_v59 = vadd.f32 %v1998_v58, %v468_v57  ;;  %v544_v62 = vmax.f32 %v466_v54, 0.0 }
 0x112   : > { %v547_v61 = vmax.f32 %v477_v56, 0.0 }
 0x113   : > { %v545_v63 = vmax.f32 %v469_v59, 0.0 }
 0x114   : > { %v569_v0 = vpack.c.bf16 %v547_v61, %v546_v60 }
 0x115   : > { %v568_v1 = vpack.c.bf16 %v545_v63, %v544_v62  ;;  %v1588_v2 = vpop.f32.mrb[20].mxu0 }
 0x116   : > { %v490_v3 = vadd.f32 %v1588_v2, %v1998_v58  ;;  %v481_v4 = vpop.f32.mrb[21].mxu0 }
 0x117   : > { %v482_v5 = vadd.f32 %v1998_v58, %v481_v4  ;;  %v1589_v6 = vpop.f32.mrb[22].mxu0  ;;  %1630 = vmatprep.mubr.bf16.mxu1 %v568_v1 }
 0x118   : > { %v493_v7 = vadd.f32 %v1589_v6, %v1998_v58  ;;  %v484_v8 = vpop.f32.mrb[23].mxu0  ;;  %1631 = vmatmul.mubr.bf16.gmra.mrb[12].mxu1 %v569_v0  ;;  %v550_v10 = vmax.f32 %v490_v3, 0.0 }
 0x119   : > { %v485_v9 = vadd.f32 %v1998_v58, %v484_v8  ;;  %v548_v12 = vmax.f32 %v482_v5, 0.0 }
 0x11a   : > { %v551_v11 = vmax.f32 %v493_v7, 0.0 }
 0x11b   : > { %v549_v13 = vmax.f32 %v485_v9, 0.0 }
 0x11c   : > { %v571_v14 = vpack.c.bf16 %v551_v11, %v550_v10 }
 0x11d   : > { %v570_v15 = vpack.c.bf16 %v549_v13, %v548_v12  ;;  %v1592_v16 = vpop.f32.mrb[24].mxu0 }
 0x11e   : > { %v506_v17 = vadd.f32 %v1592_v16, %v1998_v58  ;;  %v497_v18 = vpop.f32.mrb[25].mxu0 }
 0x11f   : > { %v498_v19 = vadd.f32 %v1998_v58, %v497_v18  ;;  %v1593_v20 = vpop.f32.mrb[26].mxu0  ;;  %1634 = vmatprep.mubr.bf16.mxu1 %v570_v15 }
 0x120   : > { %v509_v21 = vadd.f32 %v1593_v20, %v1998_v58  ;;  %v500_v22 = vpop.f32.mrb[27].mxu0  ;;  %1635 = vmatmul.mubr.bf16.gmra.mrb[16].mxu1 %v571_v14  ;;  %v554_v24 = vmax.f32 %v506_v17, 0.0 }
 0x121   : > { %v501_v23 = vadd.f32 %v1998_v58, %v500_v22  ;;  %v552_v26 = vmax.f32 %v498_v19, 0.0 }
 0x122   : > { %v555_v25 = vmax.f32 %v509_v21, 0.0 }
 0x123   : > { %v553_v27 = vmax.f32 %v501_v23, 0.0 }
 0x124   : > { %v573_v28 = vpack.c.bf16 %v555_v25, %v554_v24 }
 0x125   : > { %v572_v29 = vpack.c.bf16 %v553_v27, %v552_v26  ;;  %v1596_v30 = vpop.f32.mrb[28].mxu0 }
 0x126   : > { %v522_v31 = vadd.f32 %v1596_v30, %v1998_v58  ;;  %v513_v32 = vpop.f32.mrb[29].mxu0 }
 0x127   : > { %v514_v33 = vadd.f32 %v1998_v58, %v513_v32  ;;  %v1597_v34 = vpop.f32.mrb[30].mxu0  ;;  %1638 = vmatprep.mubr.bf16.mxu1 %v572_v29 }
 0x128   : > { %v525_v35 = vadd.f32 %v1597_v34, %v1998_v58  ;;  %v516_v36 = vpop.f32.mrb[31].mxu0  ;;  %1639 = vmatmul.mubr.bf16.gmra.mrb[20].mxu1 %v573_v28  ;;  %v558_v38 = vmax.f32 %v522_v31, 0.0 }
 0x129   : > { %v517_v37 = vadd.f32 %v1998_v58, %v516_v36  ;;  %v556_v40 = vmax.f32 %v514_v33, 0.0 }
 0x12a   : > { %v559_v39 = vmax.f32 %v525_v35, 0.0 }
 0x12b   : > { %v557_v41 = vmax.f32 %v517_v37, 0.0 }
 0x12c   : > { %v575_v42 = vpack.c.bf16 %v559_v39, %v558_v38 }
 0x12d   : > { %v574_v43 = vpack.c.bf16 %v557_v41, %v556_v40 }
 0x12f   : > { %1642 = vmatprep.mubr.bf16.mxu1 %v574_v43 }
 0x130   : > { %1643 = vmatmul.mubr.bf16.gmra.mrb[24].mxu1 %v575_v42 }
 0x1cb   : > { %v1616_v44 = vpop.f32.mrb[32].mxu0 }
 0x1cc   : > { %v681_v46 = vpop.f32.mrb[33].mxu0  ;;  %v690_v58 = vadd.f32 %v1616_v44, %v2036_v45 }
 0x1cd   : > { %v1617_v47 = vpop.f32.mrb[34].mxu0  ;;  %v682_v50 = vadd.f32 %v2036_v45, %v681_v46 }
 0x1ce   : > { %v693_v48 = vadd.f32 %v1617_v47, %v2036_v45  ;;  %v684_v49 = vpop.f32.mrb[35].mxu0 }
 0x1cf   : > { %v685_v51 = vadd.f32 %v2036_v45, %v684_v49 }
 0x1d0   : > { %v1433_v52 = vpack.c.bf16 %v693_v48, %v690_v58 }
 0x1d1   : > { %v1428_v53 = vpack.c.bf16 %v685_v51, %v682_v50 }
 0x1d2   : > { %1505 = vst [vmem:[%s2042_s18 + $0x8] sm:$0xff] %v1433_v52  }
 0x1d3   : > { %1429 = vst [vmem:[%s2042_s18] sm:$0xff] %v1428_v53   ;;  %v1620_v54 = vpop.f32.mrb[0].mxu1 }
 0x1d4   : > { %v697_v55 = vpop.f32.mrb[1].mxu1  ;;  %v706_v57 = vadd.f32 %v1620_v54, %v2036_v45 }
 0x1d5   : > { %v1621_v56 = vpop.f32.mrb[2].mxu1  ;;  %v698_v61 = vadd.f32 %v2036_v45, %v697_v55 }
 0x1d6   : > { %v709_v59 = vadd.f32 %v1621_v56, %v2036_v45  ;;  %v700_v60 = vpop.f32.mrb[3].mxu1 }
 0x1d7   : > { %v701_v62 = vadd.f32 %v2036_v45, %v700_v60 }
 0x1d8   : > { %v1443_v63 = vpack.c.bf16 %v709_v59, %v706_v57 }
 0x1d9   : > { %v1438_v0 = vpack.c.bf16 %v701_v62, %v698_v61 }
 0x1da   : > { %1507 = vst [vmem:[%s2042_s18 + $0x18] sm:$0xff] %v1443_v63  }
 0x1db   : > { %1506 = vst [vmem:[%s2042_s18 + $0x10] sm:$0xff] %v1438_v0   ;;  %v1624_v1 = vpop.f32.mrb[4].mxu1 }
 0x1dc   : > { %v713_v2 = vpop.f32.mrb[5].mxu1  ;;  %v722_v4 = vadd.f32 %v1624_v1, %v2036_v45 }
 0x1dd   : > { %v1625_v3 = vpop.f32.mrb[6].mxu1  ;;  %v714_v7 = vadd.f32 %v2036_v45, %v713_v2 }
 0x1de   : > { %v725_v5 = vadd.f32 %v1625_v3, %v2036_v45  ;;  %v716_v6 = vpop.f32.mrb[7].mxu1 }
 0x1df   : > { %v717_v8 = vadd.f32 %v2036_v45, %v716_v6 }
 0x1e0   : > { %v1453_v9 = vpack.c.bf16 %v725_v5, %v722_v4 }
 0x1e1   : > { %v1448_v10 = vpack.c.bf16 %v717_v8, %v714_v7 }
 0x1e2   : > { %1509 = vst [vmem:[%s2042_s18 + $0x28] sm:$0xff] %v1453_v9  }
 0x1e3   : > { %1508 = vst [vmem:[%s2042_s18 + $0x20] sm:$0xff] %v1448_v10   ;;  %v1628_v11 = vpop.f32.mrb[8].mxu1 }
 0x1e4   : > { %v729_v12 = vpop.f32.mrb[9].mxu1  ;;  %v738_v14 = vadd.f32 %v1628_v11, %v2036_v45 }
 0x1e5   : > { %v1629_v13 = vpop.f32.mrb[10].mxu1  ;;  %v730_v17 = vadd.f32 %v2036_v45, %v729_v12 }
 0x1e6   : > { %v741_v15 = vadd.f32 %v1629_v13, %v2036_v45  ;;  %v732_v16 = vpop.f32.mrb[11].mxu1 }
 0x1e7   : > { %v733_v18 = vadd.f32 %v2036_v45, %v732_v16 }
 0x1e8   : > { %v1463_v19 = vpack.c.bf16 %v741_v15, %v738_v14 }
 0x1e9   : > { %v1458_v20 = vpack.c.bf16 %v733_v18, %v730_v17 }
 0x1ea   : > { %1511 = vst [vmem:[%s2042_s18 + $0x38] sm:$0xff] %v1463_v19  }
 0x1eb   : > { %1510 = vst [vmem:[%s2042_s18 + $0x30] sm:$0xff] %v1458_v20   ;;  %v1632_v21 = vpop.f32.mrb[12].mxu1 }
 0x1ec   : > { %v745_v22 = vpop.f32.mrb[13].mxu1  ;;  %v754_v24 = vadd.f32 %v1632_v21, %v2036_v45 }
 0x1ed   : > { %v1633_v23 = vpop.f32.mrb[14].mxu1  ;;  %v746_v27 = vadd.f32 %v2036_v45, %v745_v22 }
 0x1ee   : > { %v757_v25 = vadd.f32 %v1633_v23, %v2036_v45  ;;  %v748_v26 = vpop.f32.mrb[15].mxu1 }
 0x1ef   : > { %v749_v28 = vadd.f32 %v2036_v45, %v748_v26 }
 0x1f0   : > { %v1473_v29 = vpack.c.bf16 %v757_v25, %v754_v24 }
 0x1f1   : > { %v1468_v30 = vpack.c.bf16 %v749_v28, %v746_v27 }
 0x1f2   : > { %1513 = vst [vmem:[%s2042_s18 + $0x48] sm:$0xff] %v1473_v29  }
 0x1f3   : > { %1512 = vst [vmem:[%s2042_s18 + $0x40] sm:$0xff] %v1468_v30   ;;  %v1636_v31 = vpop.f32.mrb[16].mxu1 }
 0x1f4   : > { %v761_v32 = vpop.f32.mrb[17].mxu1  ;;  %v770_v34 = vadd.f32 %v1636_v31, %v2036_v45 }
 0x1f5   : > { %v1637_v33 = vpop.f32.mrb[18].mxu1  ;;  %v762_v37 = vadd.f32 %v2036_v45, %v761_v32 }
 0x1f6   : > { %v773_v35 = vadd.f32 %v1637_v33, %v2036_v45  ;;  %v764_v36 = vpop.f32.mrb[19].mxu1 }
 0x1f7   : > { %v765_v38 = vadd.f32 %v2036_v45, %v764_v36 }
 0x1f8   : > { %v1483_v39 = vpack.c.bf16 %v773_v35, %v770_v34 }
 0x1f9   : > { %v1478_v40 = vpack.c.bf16 %v765_v38, %v762_v37 }
 0x1fa   : > { %1515 = vst [vmem:[%s2042_s18 + $0x58] sm:$0xff] %v1483_v39  }
 0x1fb   : > { %1514 = vst [vmem:[%s2042_s18 + $0x50] sm:$0xff] %v1478_v40   ;;  %v1640_v41 = vpop.f32.mrb[20].mxu1 }
 0x1fc   : > { %v777_v42 = vpop.f32.mrb[21].mxu1  ;;  %v786_v44 = vadd.f32 %v1640_v41, %v2036_v45 }
 0x1fd   : > { %v1641_v43 = vpop.f32.mrb[22].mxu1  ;;  %v778_v58 = vadd.f32 %v2036_v45, %v777_v42 }
 0x1fe   : > { %v789_v46 = vadd.f32 %v1641_v43, %v2036_v45  ;;  %v780_v47 = vpop.f32.mrb[23].mxu1 }
 0x1ff   : > { %v781_v48 = vadd.f32 %v2036_v45, %v780_v47 }
 0x200   : > { %v1493_v49 = vpack.c.bf16 %v789_v46, %v786_v44 }
 0x201   : > { %v1488_v50 = vpack.c.bf16 %v781_v48, %v778_v58 }
 0x202   : > { %1517 = vst [vmem:[%s2042_s18 + $0x68] sm:$0xff] %v1493_v49  }
 0x203   : > { %1516 = vst [vmem:[%s2042_s18 + $0x60] sm:$0xff] %v1488_v50   ;;  %v1644_v51 = vpop.f32.mrb[24].mxu1 }
 0x204   : > { %v793_v52 = vpop.f32.mrb[25].mxu1  ;;  %v802_v54 = vadd.f32 %v1644_v51, %v2036_v45 }
 0x205   : > { %v1645_v53 = vpop.f32.mrb[26].mxu1  ;;  %v794_v57 = vadd.f32 %v2036_v45, %v793_v52  ;;  %974 = sbr.rel (!%p1903_p4) target bundleno = 594 (0x252), region = 44 }
 0x206   : > { %v805_v55 = vadd.f32 %v1645_v53, %v2036_v45  ;;  %v796_v56 = vpop.f32.mrb[27].mxu1 }
 0x207   : > { %v797_v59 = vadd.f32 %v2036_v45, %v796_v56 }
 0x208   : > { %v1503_v60 = vpack.c.bf16 %v805_v55, %v802_v54 }
 0x209   : > { %v1498_v61 = vpack.c.bf16 %v797_v59, %v794_v57 }
 0x20a   : > { %1519 = vst [vmem:[%s2042_s18 + $0x78] sm:$0xff] %v1503_v60  }
 0x20b   : > { %1518 = vst [vmem:[%s2042_s18 + $0x70] sm:$0xff] %v1498_v61  }
 0x20c   : > { %s2237_s16 = smov (!%p977_p8, %s976_s16), 32 }
 0x20d   : > { %s1375_s27 = sshll.u32 %s2237_s16, 6 }
 0x20e   : > { %p1378_p9 = scmp.eq.s32.totalorder %s1375_s27, 0 }
 0x20f   : > { %s2101_s28 = sshrl.u32 (!%p1378_p9), %s2237_s16, 5 }
 0x210   : > { %985 = sbr.rel (%p1378_p9) target bundleno = 594 (0x252), region = 48  ;;  %p1379_p10 = scmp.le.s32.totalorder (!%p1378_p9), %s2101_s28, 0 }
 0x217   : > { %1262 = sbr.rel (%p1379_p10) target bundleno = 573 (0x23d), region = 120  ;;  %s2230_s21 = smov (!%p1379_p10), %s2095_s24 }
 0x218   : > { %s2231_s26 = smov (!%p1379_p10), %s2042_s18  ;;  %s2110_s29 = smov (!%p1379_p10), 0  }
 0x219   : > { %s2112_s30 = smov (!%p1379_p10), 0  }
 0x21e LB: >> { %v1001_v45 = vld [vmem:[%s1822_s26] sm:$0xf]  ;;  %v1003_v62 = vld [vmem:[%s1822_s26 + $0x4] sm:$0xf]  ;;  %v1005_v63 = vld [vmem:[%s1822_s26 + $0x8] sm:$0xf]  ;;  %s1830_s30 = sphi %s2112_s30, %s995_s30   ;;  %s1826_s29 = sphi %s2110_s29, %s2232_s29   ;;  %s1822_s26 = sphi %s2231_s26, %s1070_s26   ;;  %s1818_s21 = sphi %s2230_s21, %s1071_s21  }
 0x21f   : >> { %1002 = vst [vmem:[%s1818_s21] sm:$0xf] %v1001_v45  ;;  %1004 = vst [vmem:[%s1818_s21 + $0x4] sm:$0xf] %v1003_v62  ;;  %v1007_v0 = vld [vmem:[%s1822_s26 + $0xc] sm:$0xf]  ;;  %s1065_s6 = sadd.s32 1, %s1826_s29 }
 0x220   : >> { %1006 = vst [vmem:[%s1818_s21 + $0x8] sm:$0xf] %v1005_v63  ;;  %v1009_v1 = vld [vmem:[%s1822_s26 + $0x10] sm:$0xf]  ;;  %v1011_v2 = vld [vmem:[%s1822_s26 + $0x14] sm:$0xf]  ;;  %p1066_p11 = scmp.ge.s32.totalorder %s1065_s6, %s2101_s28 }
 0x221   : >> { %1008 = vst [vmem:[%s1818_s21 + $0xc] sm:$0xf] %v1007_v0  ;;  %1010 = vst [vmem:[%s1818_s21 + $0x10] sm:$0xf] %v1009_v1  ;;  %v1013_v3 = vld [vmem:[%s1822_s26 + $0x18] sm:$0xf] }
 0x222   : >> { %1012 = vst [vmem:[%s1818_s21 + $0x14] sm:$0xf] %v1011_v2  ;;  %v1015_v4 = vld [vmem:[%s1822_s26 + $0x1c] sm:$0xf]  ;;  %v1017_v5 = vld [vmem:[%s1822_s26 + $0x20] sm:$0xf] }
 0x223   : >> { %1014 = vst [vmem:[%s1818_s21 + $0x18] sm:$0xf] %v1013_v3  ;;  %1016 = vst [vmem:[%s1818_s21 + $0x1c] sm:$0xf] %v1015_v4  ;;  %v1019_v6 = vld [vmem:[%s1822_s26 + $0x24] sm:$0xf] }
 0x224   : >> { %1018 = vst [vmem:[%s1818_s21 + $0x20] sm:$0xf] %v1017_v5  ;;  %v1021_v7 = vld [vmem:[%s1822_s26 + $0x28] sm:$0xf]  ;;  %v1023_v8 = vld [vmem:[%s1822_s26 + $0x2c] sm:$0xf] }
 0x225   : >> { %1020 = vst [vmem:[%s1818_s21 + $0x24] sm:$0xf] %v1019_v6  ;;  %1022 = vst [vmem:[%s1818_s21 + $0x28] sm:$0xf] %v1021_v7  ;;  %v1025_v9 = vld [vmem:[%s1822_s26 + $0x30] sm:$0xf] }
 0x226   : >> { %1024 = vst [vmem:[%s1818_s21 + $0x2c] sm:$0xf] %v1023_v8  ;;  %v1027_v10 = vld [vmem:[%s1822_s26 + $0x34] sm:$0xf]  ;;  %v1029_v11 = vld [vmem:[%s1822_s26 + $0x38] sm:$0xf] }
 0x227   : >> { %1026 = vst [vmem:[%s1818_s21 + $0x30] sm:$0xf] %v1025_v9  ;;  %1028 = vst [vmem:[%s1818_s21 + $0x34] sm:$0xf] %v1027_v10  ;;  %v1031_v12 = vld [vmem:[%s1822_s26 + $0x3c] sm:$0xf] }
 0x228   : >> { %1030 = vst [vmem:[%s1818_s21 + $0x38] sm:$0xf] %v1029_v11  ;;  %v1033_v13 = vld [vmem:[%s1822_s26 + $0x40] sm:$0xf]  ;;  %v1035_v14 = vld [vmem:[%s1822_s26 + $0x44] sm:$0xf] }
 0x229   : >> { %1032 = vst [vmem:[%s1818_s21 + $0x3c] sm:$0xf] %v1031_v12  ;;  %1034 = vst [vmem:[%s1818_s21 + $0x40] sm:$0xf] %v1033_v13  ;;  %v1037_v15 = vld [vmem:[%s1822_s26 + $0x48] sm:$0xf] }
 0x22a   : >> { %1036 = vst [vmem:[%s1818_s21 + $0x44] sm:$0xf] %v1035_v14  ;;  %v1039_v16 = vld [vmem:[%s1822_s26 + $0x4c] sm:$0xf]  ;;  %v1041_v17 = vld [vmem:[%s1822_s26 + $0x50] sm:$0xf] }
 0x22b   : >> { %1038 = vst [vmem:[%s1818_s21 + $0x48] sm:$0xf] %v1037_v15  ;;  %1040 = vst [vmem:[%s1818_s21 + $0x4c] sm:$0xf] %v1039_v16  ;;  %v1043_v18 = vld [vmem:[%s1822_s26 + $0x54] sm:$0xf] }
 0x22c   : >> { %1042 = vst [vmem:[%s1818_s21 + $0x50] sm:$0xf] %v1041_v17  ;;  %v1045_v19 = vld [vmem:[%s1822_s26 + $0x58] sm:$0xf]  ;;  %v1047_v20 = vld [vmem:[%s1822_s26 + $0x5c] sm:$0xf] }
 0x22d   : >> { %1044 = vst [vmem:[%s1818_s21 + $0x54] sm:$0xf] %v1043_v18  ;;  %1046 = vst [vmem:[%s1818_s21 + $0x58] sm:$0xf] %v1045_v19  ;;  %v1049_v21 = vld [vmem:[%s1822_s26 + $0x60] sm:$0xf] }
 0x22e   : >> { %1048 = vst [vmem:[%s1818_s21 + $0x5c] sm:$0xf] %v1047_v20  ;;  %v1051_v22 = vld [vmem:[%s1822_s26 + $0x64] sm:$0xf]  ;;  %v1053_v23 = vld [vmem:[%s1822_s26 + $0x68] sm:$0xf] }
 0x22f   : >> { %1050 = vst [vmem:[%s1818_s21 + $0x60] sm:$0xf] %v1049_v21  ;;  %1052 = vst [vmem:[%s1818_s21 + $0x64] sm:$0xf] %v1051_v22  ;;  %v1055_v24 = vld [vmem:[%s1822_s26 + $0x6c] sm:$0xf] }
 0x230   : >> { %1054 = vst [vmem:[%s1818_s21 + $0x68] sm:$0xf] %v1053_v23  ;;  %v1057_v25 = vld [vmem:[%s1822_s26 + $0x70] sm:$0xf]  ;;  %v1059_v26 = vld [vmem:[%s1822_s26 + $0x74] sm:$0xf] }
 0x231   : >> { %1056 = vst [vmem:[%s1818_s21 + $0x6c] sm:$0xf] %v1055_v24  ;;  %1058 = vst [vmem:[%s1818_s21 + $0x70] sm:$0xf] %v1057_v25  ;;  %v1061_v27 = vld [vmem:[%s1822_s26 + $0x78] sm:$0xf] }
 0x232   : >> { %1060 = vst [vmem:[%s1818_s21 + $0x74] sm:$0xf] %v1059_v26  ;;  %v1063_v28 = vld [vmem:[%s1822_s26 + $0x7c] sm:$0xf]  ;;  %1062 = vst [vmem:[%s1818_s21 + $0x78] sm:$0xf] %v1061_v27 }
 0x233   : >> { %1064 = vst [vmem:[%s1818_s21 + $0x7c] sm:$0xf] %v1063_v28  ;;  %s2239_s6 = smov (%p1066_p11, %s1065_s6), 0  ;;  %s995_s30 = sadd.s32 1, %s1830_s30  }
 0x234   : >> { %s1380_s7 = sshll.u32 %s2239_s6, 7  ;;  %p994_p12 = scmp.ge.s32.totalorder %s995_s30, %s2101_s28 }
 0x235   : >> { %s1070_s26 = scalar_lea.vmem %s2042_s18, %s1380_s7 [#allocation2]   ;;  %s1071_s21 = scalar_lea.vmem %s2095_s24, %s1380_s7  }
 0x236   : >> { %s2232_s29 = smov %s2239_s6  ;;  %997 = sbr.rel (!%p994_p12) target bundleno = 542 (0x21e), region = 126 }
 0x23d PF: > { %s2205_s8 = sand.u32 31, %s2237_s16   ;;  %s1423_s9 = sshll.u32 %s2101_s28, 7 }
 0x23e   : > { %s1076_s10 = scalar_lea.vmem %s2042_s18, %s1423_s9 [#allocation2]   ;;  %s1078_s11 = scalar_lea.vmem %s2095_s24, %s1423_s9  }
 0x23f   : > { %p1385_p13 = scmp.le.s32.totalorder %s2205_s8, 0 }
 0x240   : > { %s1832_s12 = smov (!%p1385_p13), %s1078_s11   ;;  %s1836_s13 = smov (!%p1385_p13), %s1076_s10  }
 0x241   : > { %1276 = sbr.rel (%p1385_p13) target bundleno = 594 (0x252), region = 131  ;;  %s1840_s14 = smov (!%p1385_p13), 0  }
 0x242   : > { %s1844_s15 = smov (!%p1385_p13), 0  }
 0x248 LB: >> { %v1088_v29 = vld [vmem:[%s1838_s13] sm:$0xf]  ;;  %s1090_s16 = sadd.s32 1, %s1842_s14  ;;  %s1082_s15 = sadd.s32 1, %s1846_s15   ;;  %s1846_s15 = sphi %s1844_s15, %s1082_s15   ;;  %s1842_s14 = sphi %s1840_s14, %s1841_s14   ;;  %s1838_s13 = sphi %s1836_s13, %s1095_s13   ;;  %s1834_s12 = sphi %s1832_s12, %s1096_s12  }
 0x249   : >> { %1089 = vst [vmem:[%s1834_s12] sm:$0xf] %v1088_v29  ;;  %p1091_p0 = scmp.ge.s32.totalorder %s1090_s16, %s2205_s8  ;;  %p1081_p1 = scmp.ge.s32.totalorder %s1082_s15, %s2205_s8 }
 0x24b   : >> { %s2241_s16 = smov (%p1091_p0, %s1090_s16), 0  ;;  %1084 = sbr.rel (!%p1081_p1) target bundleno = 584 (0x248), region = 137 }
 0x24c   : >> { %s1386_s18 = sshll.u32 %s2241_s16, 2  ;;  %s1841_s14 = smov %s2241_s16  }
 0x24d   : >> { %s1095_s13 = scalar_lea.vmem %s1076_s10, %s1386_s18 [#allocation2]   ;;  %s1096_s12 = scalar_lea.vmem %s1078_s11, %s1386_s18  }
 0x252 PF: > { %p12_p2 = scmp.ge.s32.totalorder %s1893_s22, 4   ;;  %s2233_s18 = smov %s1810_s19 }
 0x253   : > { %s2234_s19 = smov %s1901_s25  ;;  %s2235_s20 = smov %s1893_s22 }
 0x254   :  { %14 = sbr.rel (!%p12_p2) target bundleno = 2 (0x2), region = 148 }

</bundles_post_ra>
